<compile_context>
chip_gen: v7x
topology: tpu7x:2x2x1
jax: 0.10.0
libtpu: 0.0.40
codegen_flags: <defaults>
</compile_context>

<pallas_src>
import math

import jax
import jax.numpy as jnp
from jax.experimental import pallas as pl
from jax.experimental.pallas import tpu as pltpu


def _round_up(x, m):
    return ((x + m - 1) // m) * m


def value_net_kernel(xt_ref,
                     w1_ref, b1_ref,
                     w2_ref, b2_ref,
                     w3_ref, b3_ref,
                     w4_ref, b4_ref,
                     o_ref):
    """Fused 4-layer MLP, feature-major layout.

    xt_ref       : (obs_dim, TILE_B)  input tile, batch on the lane axis
    w{1,2,3}_ref : (out, in)          torch-style weights (f32 or bf16)
    b{1,2,3}_ref : (out, 1)  f32      bias columns (lane-broadcast)
    w4_ref       : (hid3, 1) f32      fc4 weight as a column (VPU path)
    b4_ref       : (1, 1)    f32
    o_ref        : (1, TILE_B)        lane-dense output tile (f32)
    """
    cdt = w1_ref.dtype  # matmul operand dtype (f32 or bf16); accumulate in f32

    xt = xt_ref[...]
    h = jnp.tanh(jnp.dot(w1_ref[...], xt,
                         preferred_element_type=jnp.float32) + b1_ref[...])
    h = jnp.tanh(jnp.dot(w2_ref[...], h.astype(cdt),
                         preferred_element_type=jnp.float32) + b2_ref[...])
    h = jnp.tanh(jnp.dot(w3_ref[...], h.astype(cdt),
                         preferred_element_type=jnp.float32) + b3_ref[...])
    # fc4 (K=10, N=1): a matmul here is >99% MXU padding; do it as a VPU
    # multiply + cross-sublane reduce (XLU) instead, leaving the MXU slot free.
    out = jnp.sum(h * w4_ref[...], axis=0, keepdims=True) + b4_ref[...]
    o_ref[...] = out.astype(o_ref.dtype)


def init_linear_params(key, in_features, out_features, weight_dtype=jnp.float32):
    """torch.nn.Linear default init: U(-1/sqrt(in), 1/sqrt(in)) for W and b.

    Weight stored torch-style as (out_features, in_features); bias as a
    float32 (out_features, 1) column (lane-broadcast friendly)."""
    k_w, k_b = jax.random.split(key)
    bound = 1.0 / math.sqrt(in_features)
    w = jax.random.uniform(k_w, (out_features, in_features), jnp.float32,
                           minval=-bound, maxval=bound).astype(weight_dtype)
    b = jax.random.uniform(k_b, (out_features, 1), jnp.float32,
                           minval=-bound, maxval=bound)
    return w, b


def make_value_network_params(key, obs_dim, hid1_mult, weight_dtype=jnp.float32):
    hid1_size = obs_dim * hid1_mult
    hid3_size = 10
    hid2_size = int(math.sqrt(hid1_size * hid3_size))

    keys = jax.random.split(key, 4)
    w1, b1 = init_linear_params(keys[0], obs_dim, hid1_size, weight_dtype)
    w2, b2 = init_linear_params(keys[1], hid1_size, hid2_size, weight_dtype)
    w3, b3 = init_linear_params(keys[2], hid2_size, hid3_size, weight_dtype)
    w4, b4 = init_linear_params(keys[3], hid3_size, 1, jnp.float32)
    # fc4 runs on the VPU; keep its weight as a float32 (hid3, 1) column.
    w4 = w4.reshape(hid3_size, 1)
    return (w1, b1, w2, b2, w3, b3, w4, b4)


def value_network_forward(x, params, *, max_tile_b=1024):
    """x: (B, obs_dim)  ->  (B, 1), matching ValueNetwork.forward."""
    w1, b1, w2, b2, w3, b3, w4, b4 = params
    B, obs_dim = x.shape
    hid1, hid2, hid3 = w1.shape[0], w2.shape[0], w3.shape[0]

    # Batch tile: big enough to amortize the ~0.35us/step grid overhead, small
    # enough that the intermediates stay far under the scoped VMEM limit on all
    # of v5e/v6e/v7x.  Must be a multiple of 128 (lane-dense blocks).
    tile_b = min(max_tile_b, _round_up(B, 128))
    b_pad = _round_up(B, tile_b)
    num_tiles = b_pad // tile_b

    x_p = jnp.pad(x, ((0, b_pad - B), (0, 0))) if b_pad != B else x
    xt = x_p.T.astype(w1.dtype)              # feature-major: (obs_dim, b_pad)

    flops = 2 * B * (obs_dim * hid1 + hid1 * hid2 + hid2 * hid3 + hid3)
    transcendentals = B * (hid1 + hid2 + hid3)
    param_bytes = sum(int(p.size) * p.dtype.itemsize for p in params)
    bytes_accessed = int(xt.size) * xt.dtype.itemsize + b_pad * 4 + param_bytes

    def resident(p):  # full-array block, constant index -> DMA'd once, stays in VMEM
        return pl.BlockSpec(p.shape, lambda i: (0,) * p.ndim)

    out = pl.pallas_call(
        value_net_kernel,
        out_shape=jax.ShapeDtypeStruct((1, b_pad), jnp.float32),
        grid=(num_tiles,),
        in_specs=[pl.BlockSpec((obs_dim, tile_b), lambda i: (0, i))]
                 + [resident(p) for p in params],
        out_specs=pl.BlockSpec((1, tile_b), lambda i: (0, i)),
        compiler_params=pltpu.CompilerParams(
            dimension_semantics=("parallel",)),      # megacore sharding on v7x
        cost_estimate=pl.CostEstimate(flops=flops,
                                      transcendentals=transcendentals,
                                      bytes_accessed=bytes_accessed),
    )(xt, *params)

    return out[0, :B].reshape(B, 1).astype(x.dtype)


def value_network_ref(x, params):
    """Plain-JAX reference (batch-major, like the torch module), f32 math."""
    w1, b1, w2, b2, w3, b3, w4, b4 = [p.astype(jnp.float32) for p in params]
    x = x.astype(jnp.float32)
    h = jnp.tanh(x @ w1.T + b1[:, 0])
    h = jnp.tanh(h @ w2.T + b2[:, 0])
    h = jnp.tanh(h @ w3.T + b3[:, 0])
    return h @ w4 + b4[:, 0]


if __name__ == "__main__":
    obs_dim = 16     # N input ports of the switch network
    hid1_mult = 10   # -> hid1=160, hid2=int(sqrt(1600))=40, hid3=10

    key = jax.random.PRNGKey(0)
    k_params, k_x1, k_x2 = jax.random.split(key, 3)

    # --- float32, tiny batch (original module-style usage) ---
    params_f32 = make_value_network_params(k_params, obs_dim, hid1_mult)
    x_small = jax.random.normal(k_x1, (8, obs_dim), dtype=jnp.float32)
    out_small = jax.block_until_ready(value_network_forward(x_small, params_f32))
    ref_small = value_network_ref(x_small, params_f32)
    assert out_small.shape == (8, 1), out_small.shape
    assert jnp.allclose(out_small, ref_small, atol=1e-4, rtol=1e-4), \
        "f32 small-batch mismatch vs reference"

    # --- float32, batch not divisible by the tile: exercises grid + padding ---
    x_big = jax.random.normal(k_x2, (200, obs_dim), dtype=jnp.float32)
    out_big = jax.block_until_ready(
        value_network_forward(x_big, params_f32, max_tile_b=128))
    ref_big = value_network_ref(x_big, params_f32)
    assert out_big.shape == (200, 1), out_big.shape
    assert jnp.allclose(out_big, ref_big, atol=1e-4, rtol=1e-4), \
        "f32 tiled-batch mismatch vs reference"

    # --- bfloat16 weights/activations (MXU-native path), f32 accumulate ---
    params_bf16 = make_value_network_params(k_params, obs_dim, hid1_mult,
                                            weight_dtype=jnp.bfloat16)
    out_bf16 = jax.block_until_ready(value_network_forward(x_big, params_bf16))
    ref_bf16 = value_network_ref(x_big, params_bf16)
    assert out_bf16.shape == (200, 1), out_bf16.shape
    assert jnp.max(jnp.abs(out_bf16.astype(jnp.float32) - ref_bf16)) < 5e-2, \
        "bf16 path diverged from f32 reference"

    print("KERNEL_OK")
</pallas_src>

<mosaic_0001>
module attributes {stable_mosaic.version = 11 : i64} {
  func.func @value_net_kernel(%arg0: i32, %arg1: memref<16x128xf32, #tpu.memory_space<vmem>>, %arg2: memref<160x16xf32, #tpu.memory_space<vmem>>, %arg3: memref<160x1xf32, #tpu.memory_space<vmem>>, %arg4: memref<40x160xf32, #tpu.memory_space<vmem>>, %arg5: memref<40x1xf32, #tpu.memory_space<vmem>>, %arg6: memref<10x40xf32, #tpu.memory_space<vmem>>, %arg7: memref<10x1xf32, #tpu.memory_space<vmem>>, %arg8: memref<10x1xf32, #tpu.memory_space<vmem>>, %arg9: memref<1x1xf32, #tpu.memory_space<vmem>>, %arg10: memref<1x128xf32, #tpu.memory_space<vmem>>) attributes {dimension_semantics = [#tpu.dimension_semantics<parallel>], iteration_bounds = array<i64: 1>, scalar_prefetch = 0 : i64, scratch_operands = 0 : i64, tpu.core_type = #tpu.core_type<tc>, window_params = [{transform_indices = @transform_0, window_bounds = array<i64: 16, 128>}, {pipeline_mode = #tpu.pipeline_mode<synchronous>, transform_indices = @transform_1, window_bounds = array<i64: 160, 16>}, {pipeline_mode = #tpu.pipeline_mode<synchronous>, transform_indices = @transform_2, window_bounds = array<i64: 160, 1>}, {pipeline_mode = #tpu.pipeline_mode<synchronous>, transform_indices = @transform_3, window_bounds = array<i64: 40, 160>}, {pipeline_mode = #tpu.pipeline_mode<synchronous>, transform_indices = @transform_4, window_bounds = array<i64: 40, 1>}, {pipeline_mode = #tpu.pipeline_mode<synchronous>, transform_indices = @transform_5, window_bounds = array<i64: 10, 40>}, {pipeline_mode = #tpu.pipeline_mode<synchronous>, transform_indices = @transform_6, window_bounds = array<i64: 10, 1>}, {pipeline_mode = #tpu.pipeline_mode<synchronous>, transform_indices = @transform_7, window_bounds = array<i64: 10, 1>}, {pipeline_mode = #tpu.pipeline_mode<synchronous>, transform_indices = @transform_8, window_bounds = array<i64: 1, 1>}, {transform_indices = @transform_9, window_bounds = array<i64: 1, 128>}]} {
    %c0 = arith.constant 0 : index
    %c0_0 = arith.constant 0 : index
    %0 = vector.load %arg1[%c0, %c0_0] : memref<16x128xf32, #tpu.memory_space<vmem>>, vector<16x128xf32>
    %c0_1 = arith.constant 0 : index
    %c0_2 = arith.constant 0 : index
    %1 = vector.load %arg2[%c0_1, %c0_2] : memref<160x16xf32, #tpu.memory_space<vmem>>, vector<160x16xf32>
    %cst = arith.constant dense<0.000000e+00> : vector<160x128xf32>
    %2 = tpu.matmul %1, %0, %cst {dimension_numbers = #tpu.dot_dimension_numbers<[1], [0], [0], [1], [0, 0, 1, 1], [], []>} : vector<160x16xf32>, vector<16x128xf32>, vector<160x128xf32> -> vector<160x128xf32>
    %c0_3 = arith.constant 0 : index
    %c0_4 = arith.constant 0 : index
    %3 = vector.load %arg3[%c0_3, %c0_4] : memref<160x1xf32, #tpu.memory_space<vmem>>, vector<160x1xf32>
    %4 = vector.broadcast %3 : vector<160x1xf32> to vector<160x128xf32>
    %5 = arith.addf %2, %4 : vector<160x128xf32>
    %6 = math.tanh %5 : vector<160x128xf32>
    %c0_5 = arith.constant 0 : index
    %c0_6 = arith.constant 0 : index
    %7 = vector.load %arg4[%c0_5, %c0_6] : memref<40x160xf32, #tpu.memory_space<vmem>>, vector<40x160xf32>
    %cst_7 = arith.constant dense<0.000000e+00> : vector<40x128xf32>
    %8 = tpu.matmul %7, %6, %cst_7 {dimension_numbers = #tpu.dot_dimension_numbers<[1], [0], [0], [1], [0, 0, 1, 1], [], []>} : vector<40x160xf32>, vector<160x128xf32>, vector<40x128xf32> -> vector<40x128xf32>
    %c0_8 = arith.constant 0 : index
    %c0_9 = arith.constant 0 : index
    %9 = vector.load %arg5[%c0_8, %c0_9] : memref<40x1xf32, #tpu.memory_space<vmem>>, vector<40x1xf32>
    %10 = vector.broadcast %9 : vector<40x1xf32> to vector<40x128xf32>
    %11 = arith.addf %8, %10 : vector<40x128xf32>
    %12 = math.tanh %11 : vector<40x128xf32>
    %c0_10 = arith.constant 0 : index
    %c0_11 = arith.constant 0 : index
    %13 = vector.load %arg6[%c0_10, %c0_11] : memref<10x40xf32, #tpu.memory_space<vmem>>, vector<10x40xf32>
    %cst_12 = arith.constant dense<0.000000e+00> : vector<10x128xf32>
    %14 = tpu.matmul %13, %12, %cst_12 {dimension_numbers = #tpu.dot_dimension_numbers<[1], [0], [0], [1], [0, 0, 1, 1], [], []>} : vector<10x40xf32>, vector<40x128xf32>, vector<10x128xf32> -> vector<10x128xf32>
    %c0_13 = arith.constant 0 : index
    %c0_14 = arith.constant 0 : index
    %15 = vector.load %arg7[%c0_13, %c0_14] : memref<10x1xf32, #tpu.memory_space<vmem>>, vector<10x1xf32>
    %16 = vector.broadcast %15 : vector<10x1xf32> to vector<10x128xf32>
    %17 = arith.addf %14, %16 : vector<10x128xf32>
    %18 = math.tanh %17 : vector<10x128xf32>
    %c0_15 = arith.constant 0 : index
    %c0_16 = arith.constant 0 : index
    %19 = vector.load %arg8[%c0_15, %c0_16] : memref<10x1xf32, #tpu.memory_space<vmem>>, vector<10x1xf32>
    %20 = vector.broadcast %19 : vector<10x1xf32> to vector<10x128xf32>
    %21 = arith.mulf %18, %20 : vector<10x128xf32>
    %cst_17 = arith.constant dense<0.000000e+00> : vector<128xf32>
    %22 = vector.multi_reduction <add>, %21, %cst_17 [0] : vector<10x128xf32> to vector<128xf32>
    %23 = vector.shape_cast %22 : vector<128xf32> to vector<1x128xf32>
    %c0_18 = arith.constant 0 : index
    %c0_19 = arith.constant 0 : index
    %24 = vector.load %arg9[%c0_18, %c0_19] : memref<1x1xf32, #tpu.memory_space<vmem>>, vector<1x1xf32>
    %25 = vector.broadcast %24 : vector<1x1xf32> to vector<1x128xf32>
    %26 = arith.addf %23, %25 : vector<1x128xf32>
    %c0_20 = arith.constant 0 : index
    %c0_21 = arith.constant 0 : index
    %27 = vector.load %arg10[%c0_20, %c0_21] : memref<1x128xf32, #tpu.memory_space<vmem>>, vector<1x128xf32>
    tpu.vector_store %arg10[%c0_20, %c0_21], %26 {strides = array<i32>} : memref<1x128xf32, #tpu.memory_space<vmem>>, vector<1x128xf32>,
    return
  }
  func.func @transform_0(%arg0: i32) -> (i32, i32) {
    %c0_i32 = arith.constant 0 : i32
    %c0_i32_0 = arith.constant 0 : i32
    return %c0_i32, %arg0 : i32, i32
  }
  func.func @transform_1(%arg0: i32) -> (i32, i32) {
    %c0_i32 = arith.constant 0 : i32
    %c0_i32_0 = arith.constant 0 : i32
    %c0_i32_1 = arith.constant 0 : i32
    return %c0_i32, %c0_i32_0 : i32, i32
  }
  func.func @transform_2(%arg0: i32) -> (i32, i32) {
    %c0_i32 = arith.constant 0 : i32
    %c0_i32_0 = arith.constant 0 : i32
    %c0_i32_1 = arith.constant 0 : i32
    return %c0_i32, %c0_i32_0 : i32, i32
  }
  func.func @transform_3(%arg0: i32) -> (i32, i32) {
    %c0_i32 = arith.constant 0 : i32
    %c0_i32_0 = arith.constant 0 : i32
    %c0_i32_1 = arith.constant 0 : i32
    return %c0_i32, %c0_i32_0 : i32, i32
  }
  func.func @transform_4(%arg0: i32) -> (i32, i32) {
    %c0_i32 = arith.constant 0 : i32
    %c0_i32_0 = arith.constant 0 : i32
    %c0_i32_1 = arith.constant 0 : i32
    return %c0_i32, %c0_i32_0 : i32, i32
  }
  func.func @transform_5(%arg0: i32) -> (i32, i32) {
    %c0_i32 = arith.constant 0 : i32
    %c0_i32_0 = arith.constant 0 : i32
    %c0_i32_1 = arith.constant 0 : i32
    return %c0_i32, %c0_i32_0 : i32, i32
  }
  func.func @transform_6(%arg0: i32) -> (i32, i32) {
    %c0_i32 = arith.constant 0 : i32
    %c0_i32_0 = arith.constant 0 : i32
    %c0_i32_1 = arith.constant 0 : i32
    return %c0_i32, %c0_i32_0 : i32, i32
  }
  func.func @transform_7(%arg0: i32) -> (i32, i32) {
    %c0_i32 = arith.constant 0 : i32
    %c0_i32_0 = arith.constant 0 : i32
    %c0_i32_1 = arith.constant 0 : i32
    return %c0_i32, %c0_i32_0 : i32, i32
  }
  func.func @transform_8(%arg0: i32) -> (i32, i32) {
    %c0_i32 = arith.constant 0 : i32
    %c0_i32_0 = arith.constant 0 : i32
    %c0_i32_1 = arith.constant 0 : i32
    return %c0_i32, %c0_i32_0 : i32, i32
  }
  func.func @transform_9(%arg0: i32) -> (i32, i32) {
    %c0_i32 = arith.constant 0 : i32
    %c0_i32_0 = arith.constant 0 : i32
    return %c0_i32, %arg0 : i32, i32
  }
}

</mosaic_0001>

<bundles_post_ra>
// kernel: tpu_custom_call.1
= control target key start
LH: loop header
LB: loop body
LE: loop exit
PB: predicated region body
PF: predicated region fallthrough
CT: control target
= control target key end

     0   :  { %s1243_s0 = inlined_call_operand.vmem [shape: f32[16,128], index: 0, kind: input, shape index: {}]   ;;  %s1244_s1 = inlined_call_operand.vmem [shape: f32[160,16], index: 1, kind: input, shape index: {}]   ;;  %s1245_s2 = inlined_call_operand.vmem [shape: f32[160,1], index: 2, kind: input, shape index: {}]   ;;  %s1246_s3 = inlined_call_operand.vmem [shape: f32[40,160], index: 3, kind: input, shape index: {}]   ;;  %s1247_s4 = inlined_call_operand.vmem [shape: f32[40,1], index: 4, kind: input, shape index: {}]   ;;  %s1248_s5 = inlined_call_operand.vmem [shape: f32[10,40], index: 5, kind: input, shape index: {}]   ;;  %s1249_s6 = inlined_call_operand.vmem [shape: f32[10,1], index: 6, kind: input, shape index: {}]   ;;  %s1250_s7 = inlined_call_operand.vmem [shape: f32[10,1], index: 7, kind: input, shape index: {}]   ;;  %s1251_s8 = inlined_call_operand.<no memory space> [shape: f32[1,1], index: 8, kind: input, shape index: {}]   ;;  %s1252_s9 = inlined_call_operand.hbm [shape: f32[1,128], index: 9, kind: output, shape index: {}]  }
   0x1   :  { %v14_v0 = vstv %s1251_s8 }
   0x2   :  { %15 = vst [vmem:[#allocation2] sm:$0x1] %v14_v0 }
   0x3   :  { %v35_v1 = vld [vmem:[%s1243_s0] sm:$0xff]  ;;  %v36_v2 = vld [vmem:[%s1243_s0 + $0x8] sm:$0xff]  ;;  %vm177_vm0 = vcmask 130048   ;;  %v949_v5 = vmov 0   ;;  %v39_v7 = vld [vmem:[%s1244_s1 + $0x10] sm:$0xff] }
   0x4   :  { %v37_v3 = vld [vmem:[%s1244_s1] sm:$0xff]  ;;  %v824_v4 = vpack.c.bf16 %v36_v2, %v35_v1  ;;  %869 = vset.pattern.permute.xlu0 %v949_v5  ;;  %870 = vset.pattern.permute.xlu1 %v949_v5  ;;  %v38_v6 = vld [vmem:[%s1244_s1 + $0x8] sm:$0xff]  ;;  %v59_v9 = vld [vmem:[%s1245_s2 + $0x10] sm:$0xff] }
   0x5   :  { %781 = vmatprep.mubr.msk.f32.mxu0 %vm177_vm0, %v37_v3  ;;  %v57_v8 = vld [vmem:[%s1245_s2] sm:$0xff]  ;;  %89 = vperm.xlu1 %870, %v59_v9   ;;  %v58_v10 = vld [vmem:[%s1245_s2 + $0x8] sm:$0xff]  ;;  %v40_v11 = vld [vmem:[%s1244_s1 + $0x18] sm:$0xff] }
   0x6   :  { %825 = vmatprep.subr.bf16.mxu0 %v824_v4  ;;  %79 = vperm.xlu0 %869, %v57_v8   ;;  %v60_v12 = vld [vmem:[%s1245_s2 + $0x18] sm:$0xff]  ;;  %v41_v13 = vld [vmem:[%s1244_s1 + $0x20] sm:$0xff]  ;;  %v42_v15 = vld [vmem:[%s1244_s1 + $0x28] sm:$0xff] }
   0x7   :  { %827 = vmatpush3.bf16.msra.mxu0 %v824_v4  ;;  %v61_v14 = vld [vmem:[%s1245_s2 + $0x20] sm:$0xff]  ;;  %v62_v16 = vld [vmem:[%s1245_s2 + $0x28] sm:$0xff]  ;;  %v43_v17 = vld [vmem:[%s1244_s1 + $0x30] sm:$0xff] }
   0x8   :  { %v63_v18 = vld [vmem:[%s1245_s2 + $0x30] sm:$0xff]  ;;  %v44_v19 = vld [vmem:[%s1244_s1 + $0x38] sm:$0xff]  ;;  %v45_v21 = vld [vmem:[%s1244_s1 + $0x40] sm:$0xff] }
   0x9   :  { %94 = vperm.xlu1 %870, %v60_v12   ;;  %v64_v20 = vld [vmem:[%s1245_s2 + $0x38] sm:$0xff] }
   0xa   :  { %782 = vmatmul.mubr.msk.f32.vlgmr.msra.gmra.mrb[0].mxu0 %vm177_vm0, %v38_v6  ;;  %84 = vperm.xlu0 %869, %v58_v10  }
   0xb   :  { %784 = vmatprep.mubr.msk.f32.mxu0 %vm177_vm0, %v39_v7 }
   0xd   :  { %104 = vperm.xlu1 %870, %v62_v16  }
   0xe   :  { %785 = vmatmul.mubr.msk.f32.gmra.mrb[2].mxu0 %vm177_vm0, %v40_v11  ;;  %99 = vperm.xlu0 %869, %v61_v14  }
   0xf   :  { %787 = vmatprep.mubr.msk.f32.mxu0 %vm177_vm0, %v41_v13 }
  0x12   :  { %788 = vmatmul.mubr.msk.f32.gmra.mrb[4].mxu0 %vm177_vm0, %v42_v15 }
  0x13   :  { %790 = vmatprep.mubr.msk.f32.mxu0 %vm177_vm0, %v43_v17 }
  0x14   :  { %16 = vsyncpa [#allocation4], 0  ;;  %109 = vperm.xlu0 %869, %v63_v18   ;;  %114 = vperm.xlu1 %870, %v64_v20   ;;  %v65_v22 = vld [vmem:[%s1245_s2 + $0x40] sm:$0xff]  ;;  %v46_v23 = vld [vmem:[%s1244_s1 + $0x48] sm:$0xff]  ;;  %v950_v55 = vmov 0.0|0.0   ;;  %vm463_vm1 = vcmask 261120  }
  0x15   :  { %v66_v24 = vld [vmem:[%s1245_s2 + $0x48] sm:$0xff]  ;;  %v47_v25 = vld [vmem:[%s1244_s1 + $0x50] sm:$0xff]  ;;  %v48_v27 = vld [vmem:[%s1244_s1 + $0x58] sm:$0xff]  ;;  %828 = vmatprep.subr.bf16.mxu1 %v950_v55  ;;  %vm588_vm2 = vcmask 326656   ;;  %vm686_vm3 = vcmask 1041408  }
  0x16   :  { %791 = vmatmul.mubr.msk.f32.gmra.mrb[6].mxu0 %vm177_vm0, %v44_v19  ;;  %v67_v26 = vld [vmem:[%s1245_s2 + $0x50] sm:$0xff]  ;;  %v68_v28 = vld [vmem:[%s1245_s2 + $0x58] sm:$0xff]  ;;  %v49_v29 = vld [vmem:[%s1244_s1 + $0x60] sm:$0xff] }
  0x17   :  { %793 = vmatprep.mubr.msk.f32.mxu0 %vm177_vm0, %v45_v21  ;;  %v69_v30 = vld [vmem:[%s1245_s2 + $0x60] sm:$0xff]  ;;  %v50_v31 = vld [vmem:[%s1244_s1 + $0x68] sm:$0xff]  ;;  %v51_v33 = vld [vmem:[%s1244_s1 + $0x70] sm:$0xff] }
  0x18   :  { %119 = vperm.xlu0 %869, %v65_v22   ;;  %124 = vperm.xlu1 %870, %v66_v24   ;;  %v70_v32 = vld [vmem:[%s1245_s2 + $0x68] sm:$0xff]  ;;  %v71_v34 = vld [vmem:[%s1245_s2 + $0x70] sm:$0xff]  ;;  %v52_v35 = vld [vmem:[%s1244_s1 + $0x78] sm:$0xff] }
  0x19   :  { %v72_v36 = vld [vmem:[%s1245_s2 + $0x78] sm:$0xff]  ;;  %v53_v37 = vld [vmem:[%s1244_s1 + $0x80] sm:$0xff]  ;;  %v54_v39 = vld [vmem:[%s1244_s1 + $0x88] sm:$0xff] }
  0x1a   :  { %794 = vmatmul.mubr.msk.f32.gmra.mrb[8].mxu0 %vm177_vm0, %v46_v23  ;;  %v73_v38 = vld [vmem:[%s1245_s2 + $0x80] sm:$0xff]  ;;  %v74_v40 = vld [vmem:[%s1245_s2 + $0x88] sm:$0xff]  ;;  %v55_v41 = vld [vmem:[%s1244_s1 + $0x90] sm:$0xff] }
  0x1b   :  { %796 = vmatprep.mubr.msk.f32.mxu0 %vm177_vm0, %v47_v25  ;;  %v75_v42 = vld [vmem:[%s1245_s2 + $0x90] sm:$0xff]  ;;  %v56_v43 = vld [vmem:[%s1244_s1 + $0x98] sm:$0xff]  ;;  %v433_v45 = vld [vmem:[%s1247_s4] sm:$0xff] }
  0x1c   :  { %129 = vperm.xlu0 %869, %v67_v26   ;;  %134 = vperm.xlu1 %870, %v68_v28   ;;  %v76_v44 = vld [vmem:[%s1245_s2 + $0x98] sm:$0xff]  ;;  %v434_v46 = vld [vmem:[%s1247_s4 + $0x8] sm:$0xff]  ;;  %v435_v47 = vld [vmem:[%s1247_s4 + $0x10] sm:$0xff] }
  0x1d   :  { %v436_v48 = vld [vmem:[%s1247_s4 + $0x18] sm:$0xff]  ;;  %v437_v49 = vld [vmem:[%s1247_s4 + $0x20] sm:$0xff]  ;;  %v577_v50 = vld [vmem:[%s1249_s6 + $0x8] sm:$0x3] }
  0x1e   :  { %797 = vmatmul.mubr.msk.f32.gmra.mrb[10].mxu0 %vm177_vm0, %v48_v27  ;;  %v576_v51 = vld [vmem:[%s1249_s6] sm:$0xff]  ;;  %v673_v52 = vld [vmem:[%s1250_s7 + $0x8] sm:$0x3] }
  0x1f   :  { %799 = vmatprep.mubr.msk.f32.mxu0 %vm177_vm0, %v49_v29  ;;  %v672_v53 = vld [vmem:[%s1250_s7] sm:$0xff]  ;;  %v424_v56 = vld [vmem:[%s1246_s3 + $0x8] sm:$0xff] }
  0x20   :  { %139 = vperm.xlu0 %869, %v69_v30   ;;  %144 = vperm.xlu1 %870, %v70_v32   ;;  %v695_v54 = vld [vmem:[#allocation2] sm:$0x1] }
  0x21   :  { %741 = vmatprep.mubr.msk.f32.mxu1 %vm463_vm1, %v424_v56 }
  0x22   :  { %800 = vmatmul.mubr.msk.f32.gmra.mrb[12].mxu0 %vm177_vm0, %v50_v31 }
  0x23   :  { %802 = vmatprep.mubr.msk.f32.mxu0 %vm177_vm0, %v51_v33 }
  0x24   :  { %149 = vperm.xlu0 %869, %v71_v34   ;;  %154 = vperm.xlu1 %870, %v72_v36  }
  0x26   :  { %803 = vmatmul.mubr.msk.f32.gmra.mrb[14].mxu0 %vm177_vm0, %v52_v35 }
  0x27   :  { %805 = vmatprep.mubr.msk.f32.mxu0 %vm177_vm0, %v53_v37 }
  0x28   :  { %159 = vperm.xlu0 %869, %v73_v38   ;;  %164 = vperm.xlu1 %870, %v74_v40  }
  0x2a   :  { %806 = vmatmul.mubr.msk.f32.gmra.mrb[16].mxu0 %vm177_vm0, %v54_v39 }
  0x2b   :  { %808 = vmatprep.mubr.msk.f32.mxu0 %vm177_vm0, %v55_v41 }
  0x2c   :  { %169 = vperm.xlu0 %869, %v75_v42   ;;  %174 = vperm.xlu1 %870, %v76_v44  }
  0x2e   :  { %809 = vmatmul.mubr.msk.f32.gmra.mrb[18].mxu0 %vm177_vm0, %v56_v43 }
  0x30   :  { %440 = vperm.xlu0 %869, %v433_v45   ;;  %445 = vperm.xlu1 %870, %v434_v46  }
  0x34   :  { %450 = vperm.xlu0 %869, %v435_v47   ;;  %455 = vperm.xlu1 %870, %v436_v48  }
  0x38   :  { %460 = vperm.xlu0 %869, %v437_v49   ;;  %585 = vperm.xlu1 %870, %v577_v50  }
  0x3c   :  { %580 = vperm.xlu0 %869, %v576_v51   ;;  %681 = vperm.xlu1 %870, %v673_v52  }
  0x40   :  { %676 = vperm.xlu0 %869, %v672_v53   ;;  %698 = vperm.xlu1 %870, %v695_v54  }
  0x84   :  { %v90_v57 = vpop.permute.xlu1 %89 }
  0x85   :  { %v80_v58 = vpop.permute.xlu0 %79 }
  0x88   :  { %v95_v59 = vpop.permute.xlu1 %94 }
  0x89   :  { %v85_v60 = vpop.permute.xlu0 %84 }
  0x8c   :  { %v105_v61 = vpop.permute.xlu1 %104 }
  0x8d   :  { %v100_v62 = vpop.permute.xlu0 %99 }
  0x93   :  { %v115_v63 = vpop.permute.xlu1 %114  ;;  %v110_v1 = vpop.permute.xlu0 %109 }
  0x97   :  { %v125_v8 = vpop.permute.xlu1 %124  ;;  %v120_v10 = vpop.permute.xlu0 %119 }
  0x9b   :  { %v135_v15 = vpop.permute.xlu1 %134  ;;  %v130_v18 = vpop.permute.xlu0 %129 }
  0x9f   :  { %v145_v29 = vpop.permute.xlu1 %144  ;;  %v140_v31 = vpop.permute.xlu0 %139 }
  0xa3   :  { %v155_v40 = vpop.permute.xlu1 %154  ;;  %v150_v43 = vpop.permute.xlu0 %149 }
  0xa7   :  { %v165_v54 = vpop.permute.xlu1 %164 }
  0xdd   :  { %v783_v0 = vpop.f32.mrb[0].mxu0 }
  0xde   :  { %v310_v2 = vadd.f32 %v783_v0, %v85_v60  ;;  %v304_v3 = vpop.f32.mrb[1].mxu0 }
  0xdf   :  { %v305_v4 = vadd.f32 %v304_v3, %v80_v58 }
  0xe0   :  { %871 = vtanh.f32 %v310_v2  ;;  %v175_v2 = vpop.permute.xlu1 %174 }
  0xe1   :  { %873 = vtanh.f32 %v305_v4  ;;  %v786_v5 = vpop.f32.mrb[2].mxu0 }
  0xe2   :  { %v320_v6 = vadd.f32 %v786_v5, %v95_v59  ;;  %v314_v7 = vpop.f32.mrb[3].mxu0 }
  0xe3   :  { %v315_v9 = vadd.f32 %v314_v7, %v90_v57  ;;  %v160_v57 = vpop.permute.xlu0 %159 }
  0xe4   :  { %875 = vtanh.f32 %v320_v6 }
  0xe5   :  { %877 = vtanh.f32 %v315_v9  ;;  %v789_v11 = vpop.f32.mrb[4].mxu0 }
  0xe6   :  { %v330_v12 = vadd.f32 %v789_v11, %v105_v61  ;;  %v324_v13 = vpop.f32.mrb[5].mxu0 }
  0xe7   :  { %v325_v14 = vadd.f32 %v324_v13, %v100_v62  ;;  %v170_v5 = vpop.permute.xlu0 %169 }
  0xe8   :  { %879 = vtanh.f32 %v330_v12 }
  0xe9   :  { %881 = vtanh.f32 %v325_v14  ;;  %v792_v16 = vpop.f32.mrb[6].mxu0 }
  0xea   :  { %v872_v17 = vpop.eup %871  ;;  %v340_v19 = vadd.f32 %v792_v16, %v115_v63  ;;  %v334_v20 = vpop.f32.mrb[7].mxu0 }
  0xeb   :  { %v874_v21 = vpop.eup %873  ;;  %v335_v22 = vadd.f32 %v334_v20, %v110_v1  ;;  %v423_v20 = vld [vmem:[%s1246_s3] sm:$0xff] }
  0xec   :  { %883 = vtanh.f32 %v340_v19  ;;  %v829_v23 = vpack.c.bf16 %v872_v17, %v874_v21  ;;  %v426_v21 = vld [vmem:[%s1246_s3 + $0x18] sm:$0xff] }
  0xed   :  { %885 = vtanh.f32 %v335_v22  ;;  %v795_v24 = vpop.f32.mrb[8].mxu0  ;;  %v425_v22 = vld [vmem:[%s1246_s3 + $0x10] sm:$0xff] }
  0xee   :  { %v876_v25 = vpop.eup %875  ;;  %v350_v26 = vadd.f32 %v795_v24, %v125_v8  ;;  %v344_v27 = vpop.f32.mrb[9].mxu0  ;;  %830 = vmatpush1.bf16.msra.mxu1 %v829_v23  ;;  %v427_v23 = vld [vmem:[%s1246_s3 + $0x20] sm:$0xff]  ;;  %v430_v24 = vld [vmem:[%s1246_s3 + $0x38] sm:$0xff] }
  0xef   :  { %v878_v28 = vpop.eup %877  ;;  %v345_v30 = vadd.f32 %v344_v27, %v120_v10  ;;  %831 = vmatprep.subr.bf16.mxu1 %v950_v55  ;;  %v431_v27 = vld [vmem:[%s1246_s3 + $0x40] sm:$0xff] }
  0xf0   :  { %887 = vtanh.f32 %v350_v26  ;;  %v832_v32 = vpack.c.bf16 %v876_v25, %v878_v28  ;;  %v429_v25 = vld [vmem:[%s1246_s3 + $0x30] sm:$0xff]  ;;  %v432_v26 = vld [vmem:[%s1246_s3 + $0x48] sm:$0xff]  ;;  %v574_v28 = vld [vmem:[%s1248_s5] sm:$0xff] }
  0xf1   :  { %889 = vtanh.f32 %v345_v30  ;;  %v798_v33 = vpop.f32.mrb[10].mxu0  ;;  %821 = vmatprep.mubr.msk.f32.mxu0 %vm588_vm2, %v574_v28  ;;  %v441_v30 = vpop.permute.xlu0 %440 }
  0xf2   :  { %v880_v34 = vpop.eup %879  ;;  %v360_v35 = vadd.f32 %v798_v33, %v135_v15  ;;  %v354_v36 = vpop.f32.mrb[11].mxu0  ;;  %833 = vmatpush1.bf16.msra.mxu1 %v832_v32 }
  0xf3   :  { %v882_v37 = vpop.eup %881  ;;  %v355_v38 = vadd.f32 %v354_v36, %v130_v18  ;;  %834 = vmatprep.subr.bf16.mxu1 %v950_v55  ;;  %v446_v33 = vpop.permute.xlu1 %445 }
  0xf4   :  { %891 = vtanh.f32 %v360_v35  ;;  %v835_v39 = vpack.c.bf16 %v880_v34, %v882_v37 }
  0xf5   :  { %893 = vtanh.f32 %v355_v38  ;;  %v801_v41 = vpop.f32.mrb[12].mxu0  ;;  %v451_v38 = vpop.permute.xlu0 %450 }
  0xf6   :  { %v884_v42 = vpop.eup %883  ;;  %v370_v44 = vadd.f32 %v801_v41, %v145_v29  ;;  %v364_v45 = vpop.f32.mrb[13].mxu0  ;;  %836 = vmatpush1.bf16.msra.mxu1 %v835_v39 }
  0xf7   :  { %v886_v46 = vpop.eup %885  ;;  %v365_v47 = vadd.f32 %v364_v45, %v140_v31  ;;  %837 = vmatprep.subr.bf16.mxu1 %v950_v55  ;;  %v456_v41 = vpop.permute.xlu1 %455 }
  0xf8   :  { %895 = vtanh.f32 %v370_v44  ;;  %v838_v48 = vpack.c.bf16 %v884_v42, %v886_v46 }
  0xf9   :  { %897 = vtanh.f32 %v365_v47  ;;  %v804_v49 = vpop.f32.mrb[14].mxu0  ;;  %v461_v46 = vpop.permute.xlu0 %460 }
  0xfa   :  { %v888_v50 = vpop.eup %887  ;;  %v380_v51 = vadd.f32 %v804_v49, %v155_v40  ;;  %v374_v52 = vpop.f32.mrb[15].mxu0  ;;  %839 = vmatpush1.bf16.msra.mxu1 %v838_v48 }
  0xfb   :  { %v890_v53 = vpop.eup %889  ;;  %v375_v56 = vadd.f32 %v374_v52, %v150_v43  ;;  %840 = vmatprep.subr.bf16.mxu1 %v950_v55 }
  0xfc   :  { %899 = vtanh.f32 %v380_v51  ;;  %v841_v58 = vpack.c.bf16 %v888_v50, %v890_v53 }
  0xfd   :  { %901 = vtanh.f32 %v375_v56  ;;  %v807_v59 = vpop.f32.mrb[16].mxu0 }
  0xfe   :  { %v892_v60 = vpop.eup %891  ;;  %v390_v61 = vadd.f32 %v807_v59, %v165_v54  ;;  %v384_v62 = vpop.f32.mrb[17].mxu0  ;;  %842 = vmatpush1.bf16.msra.mxu1 %v841_v58 }
  0xff   :  { %v894_v63 = vpop.eup %893  ;;  %v385_v0 = vadd.f32 %v384_v62, %v160_v57  ;;  %843 = vmatprep.subr.bf16.mxu1 %v950_v55  ;;  %v575_v57 = vld [vmem:[%s1248_s5 + $0x8] sm:$0x3]  ;;  %v586_v58 = vpop.permute.xlu1 %585  ;;  %s951_s5 = smov [#allocation3]  }
 0x100   :  { %903 = vtanh.f32 %v390_v61  ;;  %v844_v1 = vpack.c.bf16 %v892_v60, %v894_v63  ;;  %v581_v60 = vpop.permute.xlu0 %580  ;;  %s713_s14 = sshll.u32 %s951_s5, 4  ;;  %s714_s14 = int_to_ptr.vmem [resolvable:$true] %s713_s14 }
 0x101   :  { %905 = vtanh.f32 %v385_v0  ;;  %v810_v3 = vpop.f32.mrb[18].mxu0  ;;  %s925_s15 = scalar_lea.vmem %s714_s14, 16  ;;  %s929_s16 = scalar_lea.vmem %s714_s14, 32 }
 0x102   :  { %v896_v4 = vpop.eup %895  ;;  %v400_v6 = vadd.f32 %v810_v3, %v175_v2  ;;  %v394_v7 = vpop.f32.mrb[19].mxu0  ;;  %845 = vmatpush1.bf16.msra.mxu1 %v844_v1  ;;  %p926_p0 = scmp.ne.s32.totalorder %s714_s14, %s925_s15  ;;  %p930_p1 = scmp.lt.s32.totalorder %s714_s14, %s714_s14 }
 0x103   :  { %v898_v8 = vpop.eup %897  ;;  %v395_v9 = vadd.f32 %v394_v7, %v170_v5  ;;  %846 = vmatprep.subr.bf16.mxu1 %v950_v55  ;;  %v682_v1 = vpop.permute.xlu1 %681  ;;  %v701_v7 = vlaneseq  ;;  %p931_p2 = scmp.lt.s32.totalorder %s929_s16, %s925_s15 }
 0x104   :  { %907 = vtanh.f32 %v400_v6  ;;  %v847_v10 = vpack.c.bf16 %v896_v4, %v898_v8  ;;  %v677_v3 = vpop.permute.xlu0 %676 }
 0x105   :  { %909 = vtanh.f32 %v395_v9  ;;  %p932_p3 = por %p931_p2, %p930_p1 }
 0x106   :  { %v900_v11 = vpop.eup %899  ;;  %848 = vmatpush1.bf16.msra.mxu1 %v847_v10  ;;  %v702_v10 = vshrl.u32 %v701_v7, 7 }
 0x107   :  { %v902_v12 = vpop.eup %901  ;;  %849 = vmatprep.subr.bf16.mxu1 %v950_v55  ;;  %p933_p4 = pnand %p932_p3, %p926_p0 }
 0x108   :  { %v850_v13 = vpack.c.bf16 %v900_v11, %v902_v12 }
 0x10a   :  { %v904_v14 = vpop.eup %903  ;;  %851 = vmatpush1.bf16.msra.mxu1 %v850_v13  ;;  %v703_v13 = vsub.s32 0, %v702_v10 }
 0x10b   :  { %v906_v15 = vpop.eup %905  ;;  %852 = vmatprep.subr.bf16.mxu1 %v950_v55 }
 0x10c   :  { %v853_v16 = vpack.c.bf16 %v904_v14, %v906_v15  ;;  %v699_v15 = vpop.permute.xlu1 %698 }
 0x10e   :  { %v908_v17 = vpop.eup %907  ;;  %854 = vmatpush1.bf16.msra.mxu1 %v853_v16 }
 0x10f   :  { %v910_v18 = vpop.eup %909  ;;  %855 = vmatprep.subr.bf16.mxu1 %v950_v55  ;;  %v428_v55 = vld [vmem:[%s1246_s3 + $0x28] sm:$0xff] }
 0x110   :  { %v856_v19 = vpack.c.bf16 %v908_v17, %v910_v18  ;;  %v704_v17 = vrot.slane %v699_v15, %v703_v13 }
 0x112   :  { %857 = vmatpush1.bf16.msra.mxu1 %v856_v19 }
 0x115   :  { %544 = vmatmul.mubr.f32.vlgmr.msra.gmra.mrb[0].mxu1 %v423_v20 }
 0x116   :  { %742 = vmatprep.mubr.msk.f32.mxu1 %vm463_vm1, %v426_v21 }
 0x119   :  { %549 = vmatmul.mubr.f32.gmra.mrb[2].mxu1 %v425_v22 }
 0x11a   :  { %743 = vmatprep.mubr.msk.f32.mxu1 %vm463_vm1, %v428_v55 }
 0x11d   :  { %554 = vmatmul.mubr.f32.gmra.mrb[4].mxu1 %v427_v23 }
 0x11e   :  { %744 = vmatprep.mubr.msk.f32.mxu1 %vm463_vm1, %v430_v24 }
 0x121   :  { %559 = vmatmul.mubr.f32.gmra.mrb[6].mxu1 %v429_v25 }
 0x122   :  { %745 = vmatprep.mubr.msk.f32.mxu1 %vm463_vm1, %v432_v26 }
 0x125   :  { %564 = vmatmul.mubr.f32.gmra.mrb[8].mxu1 %v431_v27 }
 0x1e8   :  { %v545_v29 = vpop.f32.mrb[0].mxu1 }
 0x1e9   :  { %v547_v31 = vpop.f32.mrb[1].mxu1  ;;  %v546_v32 = vadd.f32 %v545_v29, %v441_v30 }
 0x1eb   :  { %911 = vtanh.f32 %v546_v32 }
 0x1ec   :  { %v550_v34 = vpop.f32.mrb[2].mxu1 }
 0x1ed   :  { %v551_v35 = vadd.f32 %v550_v34, %v446_v33  ;;  %v552_v36 = vpop.f32.mrb[3].mxu1 }
 0x1ef   :  { %913 = vtanh.f32 %v551_v35 }
 0x1f0   :  { %v555_v37 = vpop.f32.mrb[4].mxu1 }
 0x1f1   :  { %v557_v39 = vpop.f32.mrb[5].mxu1  ;;  %v556_v40 = vadd.f32 %v555_v37, %v451_v38 }
 0x1f3   :  { %915 = vtanh.f32 %v556_v40 }
 0x1f4   :  { %v560_v42 = vpop.f32.mrb[6].mxu1 }
 0x1f5   :  { %v561_v43 = vadd.f32 %v560_v42, %v456_v41  ;;  %v562_v44 = vpop.f32.mrb[7].mxu1  ;;  %v912_v45 = vpop.eup %911 }
 0x1f7   :  { %917 = vtanh.f32 %v561_v43 }
 0x1f8   :  { %v565_v47 = vpop.f32.mrb[8].mxu1 }
 0x1f9   :  { %v914_v48 = vpop.eup %913  ;;  %v566_v49 = vadd.f32 %v565_v47, %v461_v46  ;;  %v567_v50 = vpop.f32.mrb[9].mxu1 }
 0x1fa   :  { %v858_v51 = vpack.c.bf16 %v914_v48, %v912_v45 }
 0x1fb   :  { %919 = vtanh.f32 %v566_v49 }
 0x1fc   :  { %859 = vmatprep.subr.bf16.mxu0 %v858_v51 }
 0x1fd   :  { %861 = vmatpush3.bf16.msra.mxu0 %v858_v51  ;;  %v916_v52 = vpop.eup %915 }
 0x201   :  { %v918_v53 = vpop.eup %917 }
 0x202   :  { %v862_v54 = vpack.c.bf16 %v918_v53, %v916_v52 }
 0x204   :  { %863 = vmatprep.subr.bf16.mxu0 %v862_v54 }
 0x205   :  { %v920_v56 = vpop.eup %919  ;;  %865 = vmatpush3.bf16.msra.mxu0 %v862_v54 }
 0x206   :  { %819 = vmatprep.subr.mxu0 %v920_v56 }
 0x209   :  { %820 = vmatpush3.msra.mxu0 %v920_v56 }
 0x20a   :  { %822 = vmatmul.mubr.msk.f32.vlgmr.msra.gmra.mrb[20].mxu0 %vm588_vm2, %v575_v57 }
 0x2dd   :  { %v823_v59 = vpop.f32.mrb[20].mxu0 }
 0x2de   :  { %v667_v61 = vadd.f32 %v823_v59, %v586_v58  ;;  %v661_v62 = vpop.f32.mrb[21].mxu0 }
 0x2df   :  { %v662_v63 = vadd.f32 %v661_v62, %v581_v60 }
 0x2e0   :  { %921 = vtanh.f32 %v667_v61 }
 0x2e1   :  { %923 = vtanh.f32 %v662_v63 }
 0x2ea   :  { %v922_v0 = vpop.eup %921 }
 0x2eb   :  { %v924_v2 = vpop.eup %923  ;;  %v685_v4 = vmul.f32 %v922_v0, %v682_v1 }
 0x2ec   :  { %v684_v5 = vmul.f32 %v924_v2, %v677_v3 }
 0x2ed   :  { %v687_v6 = vsel %vm686_vm3, %v685_v4, 0.0 }
 0x2ee   :  { %v688_v8 = vadd.f32 %v687_v6, %v684_v5 }
 0x2f0   :  { %v689_v9 = vrot.slane %v688_v8, 4 }
 0x2f2   :  { %v690_v11 = vadd.f32 %v689_v9, %v688_v8 }
 0x2f4   :  { %v691_v12 = vrot.slane %v690_v11, 2 }
 0x2f6   :  { %v692_v14 = vadd.f32 %v691_v12, %v690_v11 }
 0x2f8   :  { %v693_v16 = vrot.slane %v692_v14, 1 }
 0x2fa   :  { %v694_v18 = vadd.f32 %v693_v16, %v692_v14 }
 0x2fc   :  { %v705_v19 = vadd.f32 %v704_v17, %v694_v18 }
 0x2fe   :  { %706 = vst [vmem:[#allocation3] sm:$0x1] %v705_v19 }
 0x2ff   :  { %936 = shalt.err (!%p933_p4)
}
 0x300   :  { %s937_s4 = scalar_lea.hbm %s1252_s9, 16 }
 0x301   :  { %p938_p5 = scmp.ne.s32.totalorder %s1252_s9, %s937_s4  ;;  %p941_p6 = scmp.lt.u32.totalorder %s937_s4, %s1252_s9 }
 0x303   :  { %p943_p7 = pnand %p941_p6, %p938_p5 }
 0x305   :  { %946 = shalt.err (!%p943_p7)
}
 0x306   :  { %716 = dma.vmem_to_hbm [thread:$0]  %s714_s14, 16, %s1252_s9, [#allocation4]  }
 0x307   :  { %947 = dma.done.wait [#allocation4], 16  }
 0x308   :  { %948 = vsyncadd [#allocation4], 4294967280 }
 0x309   :  { %720 = vsyncpa [#allocation4], 1 }

</bundles_post_ra>
